<compile_context>
chip_gen: v5e
topology: v5e:2x2
jax: 0.10.0
libtpu: 0.0.40
codegen_flags: <defaults>
</compile_context>

<pallas_src>
import jax
import jax.numpy as jnp
from jax.experimental import pallas as pl
from jax.experimental.pallas import tpu as pltpu

_LANE = 128        # channel dims padded to a multiple of this (unmasked stores)
_SUBLANE = 8       # row-tile / small contraction alignment
_MAX_ROW_TILE = 512


def _round_up(x, m):
    return (x + m - 1) // m * m


def _cdiv(a, b):
    return -(-a // b)


def _pick_row_tile(n):
    """Row-tile size (multiple of 8, <= 512) minimizing N padding."""
    n8 = _round_up(n, _SUBLANE)
    if n8 <= _MAX_ROW_TILE:
        return n8
    tiles = _cdiv(n8, _MAX_ROW_TILE)
    return _round_up(_cdiv(n8, tiles), _SUBLANE)


def _pad2(w, rows, cols):
    return jnp.pad(w, ((0, rows - w.shape[0]), (0, cols - w.shape[1])))


# -----------------------------------------------------------------------------
# Pallas kernels
# -----------------------------------------------------------------------------
def _encoder_kernel(x_ref, w1_ref, b1_ref, w2_ref, b2_ref, lat_ref):
    # x_ref: (1, TN, C_pad)    weights: full arrays    lat_ref: (1, 1, L_pad)
    # lat_ref stays resident across the row-tile ("arbitrary") grid axis.
    t = pl.program_id(1)
    x = x_ref[0]                                                    # (TN, C_pad)
    h = jnp.maximum(
        jnp.dot(x, w1_ref[...], preferred_element_type=jnp.float32) + b1_ref[...],
        0.0)                                                        # (TN, H_pad)
    z = jnp.maximum(
        jnp.dot(h, w2_ref[...], preferred_element_type=jnp.float32) + b2_ref[...],
        0.0)                                                        # (TN, L_pad)
    z_max = jnp.max(z, axis=0, keepdims=True)                       # (1, L_pad)

    @pl.when(t == 0)
    def _():
        lat_ref[0] = z_max

    @pl.when(t > 0)
    def _():
        lat_ref[0] = jnp.maximum(lat_ref[0], z_max)


def _decoder_kernel(q_ref, bias_ref, w3_ref, w4_ref, b4_ref, o_ref):
    # q_ref: (1, TR, C_pad)   bias_ref: (1, 1, H_pad)  (per-batch latent proj.)
    q = q_ref[0]                                                    # (TR, C_pad)
    h = jnp.maximum(
        jnp.dot(q, w3_ref[...], preferred_element_type=jnp.float32) + bias_ref[0],
        0.0)                                                        # (TR, H_pad)
    o_ref[0] = (jnp.dot(h, w4_ref[...], preferred_element_type=jnp.float32)
                + b4_ref[...])                                      # (TR, Q_pad)


# -----------------------------------------------------------------------------
# Wrappers calling pallas_call
# -----------------------------------------------------------------------------
def encoder_pallas(points, feats, params):
    B, N, _ = points.shape
    D = feats.shape[-1]
    H = params["w1p"].shape[-1]
    L = params["w2"].shape[-1]

    C = 3 + D
    C_pad = _round_up(C, _SUBLANE)
    H_pad = _round_up(H, _LANE)
    L_pad = _round_up(L, _LANE)
    TN = _pick_row_tile(N)
    N_pad = _round_up(N, TN)

    # Host-side concat -> single layer-1 matmul; replicate the last valid row
    # into the N padding so the max-pool result is unchanged.
    x = jnp.concatenate([points, feats], axis=-1).astype(jnp.float32)  # (B,N,C)
    x = jnp.pad(x, ((0, 0), (0, N_pad - N), (0, 0)), mode="edge")
    x = jnp.pad(x, ((0, 0), (0, 0), (0, C_pad - C)))

    w1 = _pad2(jnp.concatenate([params["w1p"], params["w1f"]], axis=0),
               C_pad, H_pad)
    b1 = _pad2(params["b1"], 1, H_pad)
    w2 = _pad2(params["w2"], H_pad, L_pad)
    b2 = _pad2(params["b2"], 1, L_pad)

    full = lambda shape: pl.BlockSpec(shape, lambda b, t: (0,) * len(shape))
    lat_pad = pl.pallas_call(
        _encoder_kernel,
        out_shape=jax.ShapeDtypeStruct((B, 1, L_pad), jnp.float32),
        grid=(B, N_pad // TN),
        in_specs=[
            pl.BlockSpec((1, TN, C_pad), lambda b, t: (b, t, 0)),
            full((C_pad, H_pad)),
            full((1, H_pad)),
            full((H_pad, L_pad)),
            full((1, L_pad)),
        ],
        out_specs=pl.BlockSpec((1, 1, L_pad), lambda b, t: (b, 0, 0)),
        compiler_params=pltpu.CompilerParams(
            dimension_semantics=("parallel", "arbitrary")),
    )(x, w1, b1, w2, b2)
    return lat_pad[:, 0, :L]


def decoder_pallas(query, latent, params):
    B, N, _ = query.shape
    H = params["w3q"].shape[-1]
    Q = params["w4"].shape[-1]

    C_pad = _round_up(3, _SUBLANE)
    H_pad = _round_up(H, _LANE)
    Q_pad = _round_up(Q, _LANE)
    TR = _pick_row_tile(N)
    N_pad = _round_up(N, TR)

    q = jnp.pad(query.astype(jnp.float32),
                ((0, 0), (0, N_pad - N), (0, C_pad - 3)))

    # Fold the latent projection out of the hot loop: one tiny (B,L)@(L,H)
    # XLA matmul producing a per-batch bias row consumed by every row tile.
    bias = latent @ params["w3l"] + params["b3"]                    # (B, H)
    bias = jnp.pad(bias, ((0, 0), (0, H_pad - H)))[:, None, :]      # (B, 1, H_pad)

    w3 = _pad2(params["w3q"], C_pad, H_pad)
    w4 = _pad2(params["w4"], H_pad, Q_pad)
    b4 = _pad2(params["b4"], 1, Q_pad)

    full = lambda shape: pl.BlockSpec(shape, lambda b, t: (0,) * len(shape))
    out_pad = pl.pallas_call(
        _decoder_kernel,
        out_shape=jax.ShapeDtypeStruct((B, N_pad, Q_pad), jnp.float32),
        grid=(B, N_pad // TR),
        in_specs=[
            pl.BlockSpec((1, TR, C_pad), lambda b, t: (b, t, 0)),
            pl.BlockSpec((1, 1, H_pad), lambda b, t: (b, 0, 0)),
            full((C_pad, H_pad)),
            full((H_pad, Q_pad)),
            full((1, Q_pad)),
        ],
        out_specs=pl.BlockSpec((1, TR, Q_pad), lambda b, t: (b, t, 0)),
        compiler_params=pltpu.CompilerParams(
            dimension_semantics=("parallel", "parallel")),
    )(q, bias, w3, w4, b4)
    return out_pad[:, :N, :Q]


# -----------------------------------------------------------------------------
# FeatureField: same API/semantics as the PyTorch module
# -----------------------------------------------------------------------------
class FeatureField:
    def __init__(self, encoder, decoder):
        self.encoder = encoder
        self.decoder = decoder
        self.input_encoding = None

    def reset(self):
        self.input_encoding = None

    def forward(self, input_points, input_features):
        self.encode(input_points, input_features)
        return self.evaluate(input_points)

    __call__ = forward

    def encode(self, input_points, input_features=None):
        if self.input_encoding is not None:
            raise RuntimeError("Can not call encode() before reset().")
        self.input_encoding = self.encoder(input_points, input_features)

    def evaluate(self, query_points):
        if self.input_encoding is None:
            raise RuntimeError("Can not call evaluate() before encode().")
        return self.decoder(query_points, self.input_encoding)


# -----------------------------------------------------------------------------
# Deterministic parameter init (PyTorch nn.Linear-style uniform)
# -----------------------------------------------------------------------------
def init_params(key, d_in_feat, hidden, latent, q_out):
    def lin(k, fan_in, shape):
        bound = 1.0 / jnp.sqrt(jnp.float32(fan_in))
        return jax.random.uniform(k, shape, jnp.float32, -bound, bound)

    ks = jax.random.split(key, 10)
    enc = {
        "w1p": lin(ks[0], 3 + d_in_feat, (3, hidden)),
        "w1f": lin(ks[1], 3 + d_in_feat, (d_in_feat, hidden)),
        "b1":  lin(ks[2], 3 + d_in_feat, (1, hidden)),
        "w2":  lin(ks[3], hidden, (hidden, latent)),
        "b2":  lin(ks[4], hidden, (1, latent)),
    }
    dec = {
        "w3q": lin(ks[5], 3 + latent, (3, hidden)),
        "w3l": lin(ks[6], 3 + latent, (latent, hidden)),
        "b3":  lin(ks[7], 3 + latent, (1, hidden)),
        "w4":  lin(ks[8], hidden, (hidden, q_out)),
        "b4":  lin(ks[9], hidden, (1, q_out)),
    }
    return enc, dec


# Pure-JAX reference for correctness checking.
def reference_forward(points, feats, enc_p, dec_p):
    h = jnp.maximum(points @ enc_p["w1p"] + feats @ enc_p["w1f"] + enc_p["b1"], 0.0)
    z = jnp.maximum(h @ enc_p["w2"] + enc_p["b2"], 0.0)
    lat = jnp.max(z, axis=1)                                  # (B, L)
    h2 = jnp.maximum(points @ dec_p["w3q"] + lat[:, None, :] @ dec_p["w3l"]
                     + dec_p["b3"], 0.0)
    return h2 @ dec_p["w4"] + dec_p["b4"]


if __name__ == "__main__":
    B, N, D = 2, 8, 4        # batch, num points, input feature dim
    HIDDEN, LATENT, QOUT = 32, 16, 8

    key = jax.random.PRNGKey(0)
    k_pts, k_feat, k_param = jax.random.split(key, 3)
    input_points = jax.random.normal(k_pts, (B, N, 3), jnp.float32)
    input_features = jax.random.normal(k_feat, (B, N, D), jnp.float32)

    enc_params, dec_params = init_params(k_param, D, HIDDEN, LATENT, QOUT)

    enc_fn = jax.jit(lambda pts, feats: encoder_pallas(pts, feats, enc_params))
    dec_fn = jax.jit(lambda qry, lat: decoder_pallas(qry, lat, dec_params))

    field = FeatureField(encoder=enc_fn, decoder=dec_fn)

    out = field(input_points, input_features)      # forward = encode + evaluate
    out = jax.block_until_ready(out)

    assert out.shape == (B, N, QOUT), out.shape
    ref = reference_forward(input_points, input_features, enc_params, dec_params)
    assert jnp.allclose(out, ref, atol=1e-4, rtol=1e-4), "mismatch vs JAX reference"

    # Secondary check: larger N exercises the multi-row-tile path (edge-padded
    # running-max accumulator in the encoder, sliced zero-padding in decoder).
    N2 = 700
    k2a, k2b = jax.random.split(jax.random.PRNGKey(1))
    pts2 = jax.random.normal(k2a, (B, N2, 3), jnp.float32)
    feats2 = jax.random.normal(k2b, (B, N2, D), jnp.float32)
    lat2 = enc_fn(pts2, feats2)
    out2 = jax.block_until_ready(dec_fn(pts2, lat2))
    ref2 = reference_forward(pts2, feats2, enc_params, dec_params)
    assert out2.shape == (B, N2, QOUT), out2.shape
    assert jnp.allclose(out2, ref2, atol=1e-4, rtol=1e-4), "mismatch (tiled path)"

    print("KERNEL_OK")
</pallas_src>

<mosaic_0001>
module attributes {stable_mosaic.version = 11 : i64} {
  func.func @_encoder_kernel(%arg0: i32, %arg1: i32, %arg2: memref<1x8x8xf32, #tpu.memory_space<vmem>>, %arg3: memref<8x128xf32, #tpu.memory_space<vmem>>, %arg4: memref<1x128xf32, #tpu.memory_space<vmem>>, %arg5: memref<128x128xf32, #tpu.memory_space<vmem>>, %arg6: memref<1x128xf32, #tpu.memory_space<vmem>>, %arg7: memref<1x1x128xf32, #tpu.memory_space<vmem>>) attributes {dimension_semantics = [#tpu.dimension_semantics<parallel>, #tpu.dimension_semantics<arbitrary>], iteration_bounds = array<i64: 2, 1>, scalar_prefetch = 0 : i64, scratch_operands = 0 : i64, tpu.core_type = #tpu.core_type<tc>, window_params = [{transform_indices = @transform_0, window_bounds = array<i64: 1, 8, 8>}, {pipeline_mode = #tpu.pipeline_mode<synchronous>, transform_indices = @transform_1, window_bounds = array<i64: 8, 128>}, {pipeline_mode = #tpu.pipeline_mode<synchronous>, transform_indices = @transform_2, window_bounds = array<i64: 1, 128>}, {pipeline_mode = #tpu.pipeline_mode<synchronous>, transform_indices = @transform_3, window_bounds = array<i64: 128, 128>}, {pipeline_mode = #tpu.pipeline_mode<synchronous>, transform_indices = @transform_4, window_bounds = array<i64: 1, 128>}, {transform_indices = @transform_5, window_bounds = array<i64: 1, 1, 128>}]} {
    %c0 = arith.constant 0 : index
    %c0_0 = arith.constant 0 : index
    %c0_1 = arith.constant 0 : index
    %0 = vector.load %arg2[%c0, %c0_0, %c0_1] : memref<1x8x8xf32, #tpu.memory_space<vmem>>, vector<1x8x8xf32>
    %1 = vector.shape_cast %0 : vector<1x8x8xf32> to vector<8x8xf32>
    %c0_2 = arith.constant 0 : index
    %c0_3 = arith.constant 0 : index
    %2 = vector.load %arg3[%c0_2, %c0_3] : memref<8x128xf32, #tpu.memory_space<vmem>>, vector<8x128xf32>
    %cst = arith.constant dense<0.000000e+00> : vector<8x128xf32>
    %3 = tpu.matmul %1, %2, %cst {dimension_numbers = #tpu.dot_dimension_numbers<[1], [0], [0], [1], [0, 0, 1, 1], [], []>} : vector<8x8xf32>, vector<8x128xf32>, vector<8x128xf32> -> vector<8x128xf32>
    %c0_4 = arith.constant 0 : index
    %c0_5 = arith.constant 0 : index
    %4 = vector.load %arg4[%c0_4, %c0_5] : memref<1x128xf32, #tpu.memory_space<vmem>>, vector<1x128xf32>
    %5 = vector.broadcast %4 : vector<1x128xf32> to vector<8x128xf32>
    %6 = arith.addf %3, %5 : vector<8x128xf32>
    %cst_6 = arith.constant 0.000000e+00 : f32
    %7 = vector.broadcast %cst_6 : f32 to vector<8x128xf32>
    %8 = arith.maximumf %6, %7 : vector<8x128xf32>
    %c0_7 = arith.constant 0 : index
    %c0_8 = arith.constant 0 : index
    %9 = vector.load %arg5[%c0_7, %c0_8] : memref<128x128xf32, #tpu.memory_space<vmem>>, vector<128x128xf32>
    %cst_9 = arith.constant dense<0.000000e+00> : vector<8x128xf32>
    %10 = tpu.matmul %8, %9, %cst_9 {dimension_numbers = #tpu.dot_dimension_numbers<[1], [0], [0], [1], [0, 0, 1, 1], [], []>} : vector<8x128xf32>, vector<128x128xf32>, vector<8x128xf32> -> vector<8x128xf32>
    %c0_10 = arith.constant 0 : index
    %c0_11 = arith.constant 0 : index
    %11 = vector.load %arg6[%c0_10, %c0_11] : memref<1x128xf32, #tpu.memory_space<vmem>>, vector<1x128xf32>
    %12 = vector.broadcast %11 : vector<1x128xf32> to vector<8x128xf32>
    %13 = arith.addf %10, %12 : vector<8x128xf32>
    %cst_12 = arith.constant 0.000000e+00 : f32
    %14 = vector.broadcast %cst_12 : f32 to vector<8x128xf32>
    %15 = arith.maximumf %13, %14 : vector<8x128xf32>
    %cst_13 = arith.constant dense<0xFF800000> : vector<128xf32>
    %16 = vector.multi_reduction <maximumf>, %15, %cst_13 [0] : vector<8x128xf32> to vector<128xf32>
    %17 = vector.shape_cast %16 : vector<128xf32> to vector<1x128xf32>
    %c0_i32 = arith.constant 0 : i32
    %18 = arith.cmpi eq, %arg1, %c0_i32 : i32
    %19 = arith.extui %18 : i1 to i32
    %c0_i32_14 = arith.constant 0 : i32
    %20 = arith.cmpi ne, %19, %c0_i32_14 : i32
    scf.if %20 {
      %c0_17 = arith.constant 0 : index
      %c0_18 = arith.constant 0 : index
      %c0_19 = arith.constant 0 : index
      %24 = vector.load %arg7[%c0_17, %c0_18, %c0_19] : memref<1x1x128xf32, #tpu.memory_space<vmem>>, vector<1x1x128xf32>
      %25 = vector.shape_cast %24 : vector<1x1x128xf32> to vector<1x128xf32>
      %26 = vector.shape_cast %17 : vector<1x128xf32> to vector<1x1x128xf32>
      tpu.vector_store %arg7[%c0_17, %c0_18, %c0_19], %26 {strides = array<i32>} : memref<1x1x128xf32, #tpu.memory_space<vmem>>, vector<1x1x128xf32>,
    } else {
    }
    %c0_i32_15 = arith.constant 0 : i32
    %21 = arith.cmpi sgt, %arg1, %c0_i32_15 : i32
    %22 = arith.extui %21 : i1 to i32
    %c0_i32_16 = arith.constant 0 : i32
    %23 = arith.cmpi ne, %22, %c0_i32_16 : i32
    scf.if %23 {
      %c0_17 = arith.constant 0 : index
      %c0_18 = arith.constant 0 : index
      %c0_19 = arith.constant 0 : index
      %24 = vector.load %arg7[%c0_17, %c0_18, %c0_19] : memref<1x1x128xf32, #tpu.memory_space<vmem>>, vector<1x1x128xf32>
      %25 = vector.shape_cast %24 : vector<1x1x128xf32> to vector<1x128xf32>
      %26 = arith.maximumf %25, %17 : vector<1x128xf32>
      %c0_20 = arith.constant 0 : index
      %c0_21 = arith.constant 0 : index
      %c0_22 = arith.constant 0 : index
      %27 = vector.load %arg7[%c0_20, %c0_21, %c0_22] : memref<1x1x128xf32, #tpu.memory_space<vmem>>, vector<1x1x128xf32>
      %28 = vector.shape_cast %27 : vector<1x1x128xf32> to vector<1x128xf32>
      %29 = vector.shape_cast %26 : vector<1x128xf32> to vector<1x1x128xf32>
      tpu.vector_store %arg7[%c0_20, %c0_21, %c0_22], %29 {strides = array<i32>} : memref<1x1x128xf32, #tpu.memory_space<vmem>>, vector<1x1x128xf32>,
    } else {
    }
    return
  }
  func.func @transform_0(%arg0: i32, %arg1: i32) -> (i32, i32, i32) {
    %c0_i32 = arith.constant 0 : i32
    %c0_i32_0 = arith.constant 0 : i32
    return %arg0, %arg1, %c0_i32 : i32, i32, i32
  }
  func.func @transform_1(%arg0: i32, %arg1: i32) -> (i32, i32) {
    %c0_i32 = arith.constant 0 : i32
    %c0_i32_0 = arith.constant 0 : i32
    %c0_i32_1 = arith.constant 0 : i32
    return %c0_i32, %c0_i32_0 : i32, i32
  }
  func.func @transform_2(%arg0: i32, %arg1: i32) -> (i32, i32) {
    %c0_i32 = arith.constant 0 : i32
    %c0_i32_0 = arith.constant 0 : i32
    %c0_i32_1 = arith.constant 0 : i32
    return %c0_i32, %c0_i32_0 : i32, i32
  }
  func.func @transform_3(%arg0: i32, %arg1: i32) -> (i32, i32) {
    %c0_i32 = arith.constant 0 : i32
    %c0_i32_0 = arith.constant 0 : i32
    %c0_i32_1 = arith.constant 0 : i32
    return %c0_i32, %c0_i32_0 : i32, i32
  }
  func.func @transform_4(%arg0: i32, %arg1: i32) -> (i32, i32) {
    %c0_i32 = arith.constant 0 : i32
    %c0_i32_0 = arith.constant 0 : i32
    %c0_i32_1 = arith.constant 0 : i32
    return %c0_i32, %c0_i32_0 : i32, i32
  }
  func.func @transform_5(%arg0: i32, %arg1: i32) -> (i32, i32, i32) {
    %c0_i32 = arith.constant 0 : i32
    %c0_i32_0 = arith.constant 0 : i32
    %c0_i32_1 = arith.constant 0 : i32
    return %arg0, %c0_i32, %c0_i32_0 : i32, i32, i32
  }
}

</mosaic_0001>

<bundles_post_ra>
// kernel: _lambda_.1
= control target key start
LH: loop header
LB: loop body
LE: loop exit
PB: predicated region body
PF: predicated region fallthrough
CT: control target
= control target key end

     0   :  { %10 = vsyncpa [#allocation3], 0  ;;  %s777_s0 = inlined_call_operand.vmem [shape: f32[2,8,8], index: 0, kind: input, shape index: {}]   ;;  %s778_s1 = inlined_call_operand.vmem [shape: f32[8,128], index: 1, kind: input, shape index: {}]   ;;  %s779_s2 = inlined_call_operand.vmem [shape: f32[1,128], index: 2, kind: input, shape index: {}]   ;;  %s780_s3 = inlined_call_operand.hbm [shape: f32[128,128], index: 3, kind: input, shape index: {}]   ;;  %s781_s4 = inlined_call_operand.vmem [shape: f32[1,128], index: 4, kind: input, shape index: {}]   ;;  %s782_s5 = inlined_call_operand.hbm [shape: f32[2,1,128], index: 5, kind: output, shape index: {}]  }
   0x1   :  { %11 = vsyncpa [#allocation4], 0 }
   0x2   :  { %13 = vsyncpa [#allocation4 + $0x1], 0  ;;  %s668_s18 = smov 0   ;;  %s670_s19 = smov 0  }
   0x3   :  { %s672_s20 = smov 0   ;;  %s674_s21 = smov 0  }
   0x4   :  { %s676_s22 = smov 0   ;;  %s678_s23 = smov 0  }
   0x5 LB: > { %s440_s24 = sadd.s32 4294967295, %s633_s23   ;;  %s441_s25 = sadd.s32 4294967294, %s633_s23   ;;  %s633_s23 = sphi %s678_s23, %s19_s23   ;;  %s629_s22 = sphi %s676_s22, %s789_s22   ;;  %s625_s21 = sphi %s674_s21, %s788_s21   ;;  %s621_s20 = sphi %s672_s20, %s787_s20   ;;  %s617_s19 = sphi %s670_s19, %s786_s19   ;;  %s613_s18 = sphi %s668_s18, %s785_s18  }
   0x6   : > { %s31_s26 = sadd.s32 1, %s629_s22  ;;  %s150_s27 = sadd.s32 1, %s621_s20 }
   0x7   : > { %p33_p0 = scmp.ge.s32.totalorder %s31_s26, 2  ;;  %p160_p1 = scmp.ne.s32.totalorder %s621_s20, %s617_s19 }
   0x8   : > { %p161_p2 = scmp.eq.s32.totalorder %s440_s24, 1  ;;  %p166_p3 = scmp.ne.s32.totalorder %s617_s19, %s613_s18 }
   0x9   : > { %s791_s26 = smov (%p33_p0, %s31_s26), 0  ;;  %p167_p5 = scmp.eq.s32.totalorder %s441_s25, 1 }
   0xa   : > { %p708_p4 = por %p161_p2, %p160_p1  ;;  %s147_s29 = ssub.s32 %s629_s22, %s791_s26 }
   0xb   : > { %p442_p6 = scmp.ge.s32.totalorder %s633_s23, 1  ;;  %p148_p7 = scmp.eq.s32.totalorder %s147_s29, 0 }
   0xc   : > { %p715_p8 = por %p167_p5, %p166_p3  ;;  %p174_p9 = scmp.lt.s32.totalorder %s633_s23, 3 }
   0xd   : > { %s721_s6 = scalar_select %p148_p7, %s621_s20, %s150_s27  }
   0xe   : > { %p175_p10 = pnand %p442_p6, %p174_p9  ;;  %p465_p11 = scmp.eq.s32.totalorder %s440_s24, 0 }
   0xf   : > { %s191_s9 = sshll.u32 %s780_s3, 4  ;;  %s635_s10 = smov [#allocation2]   ;;  %s192_s9 = int_to_ptr.hbm [resolvable:$true] %s191_s9 }
  0x10   : > { %p457_p12 = pneg %p175_p10  ;;  %s193_s11 = sshll.u32 %s635_s10, 4  ;;  %s194_s11 = int_to_ptr.vmem [resolvable:$true] %s193_s11 }
  0x11   : > { %s636_s12 = smov 128   ;;  %s637_s13 = smov 8  }
  0x12   : > { %p458_p13 = pnand %p465_p11, %p457_p12  ;;  %222 = sbr.rel (%p175_p10) target bundleno = 306 (0x132), region = 40 }
  0x14   : > { %460 = dma.hbm_to_vmem [thread:$0]  (!%p458_p13), %s192_s9, 2048, %s194_s11, [#allocation3], %s636_s12, %s636_s12, %s637_s13  }
  0x17   : > { %604 = dma.done.wait (%p465_p11), [#allocation3], 2048  }
  0x18   : > { %606 = vsyncadd (%p465_p11), [#allocation3], 4294965248  ;;  %p252_p0 = scmp.lt.s32.totalorder %s625_s21, 1  ;;  %vm265_vm0 = vcmask 64512   ;;  %v260_v0 = vld [vmem:[%s778_s1] sm:$0xff]  ;;  %v305_v2 = vld [vmem:[#allocation2 + $0x78] sm:$0xff]  ;;  %s358_s13 = scalar_lea.hbm %s782_s5, %s625_s21 }
  0x19   : > { %284 = vmatpush.msra.mxu0 %v260_v0  ;;  %310 = vmatpush.msra.mxu1 %v305_v2  ;;  %v304_v3 = vld [vmem:[#allocation2 + $0x70] sm:$0xff]  ;;  %v303_v4 = vld [vmem:[#allocation2 + $0x68] sm:$0xff]  ;;  %v302_v5 = vld [vmem:[#allocation2 + $0x60] sm:$0xff]  ;;  %s250_s10 = sand.u32 1, %s617_s19   ;;  %s362_s16 = sshll.u32 %s358_s13, 4  ;;  %s363_s16 = int_to_ptr.hbm [resolvable:$true] %s362_s16 }
  0x1a   : > { %s253_s14 = scalar_select %p252_p0, %s625_s21, 1  ;;  %v301_v6 = vld [vmem:[#allocation2 + $0x58] sm:$0xff]  ;;  %v300_v7 = vld [vmem:[#allocation2 + $0x50] sm:$0xff]  ;;  %v299_v8 = vld [vmem:[#allocation2 + $0x48] sm:$0xff] }
  0x1b   : > { %311 = vmatpush.msra.mxu1 %v304_v3  ;;  %v298_v9 = vld [vmem:[#allocation2 + $0x40] sm:$0xff]  ;;  %v297_v10 = vld [vmem:[#allocation2 + $0x38] sm:$0xff]  ;;  %v296_v11 = vld [vmem:[#allocation2 + $0x30] sm:$0xff]  ;;  %s350_s17 = scalar_lea.sflag [#allocation4], %s250_s10  ;;  %s571_s21 = scalar_lea.hbm %s782_s5, 2 }
  0x1c   : > { %s447_s15 = sshll.u32 %s253_s14, 3  ;;  %v295_v12 = vld [vmem:[#allocation2 + $0x28] sm:$0xff]  ;;  %v294_v13 = vld [vmem:[#allocation2 + $0x20] sm:$0xff]  ;;  %v293_v14 = vld [vmem:[#allocation2 + $0x18] sm:$0xff]  ;;  %s251_s14 = scalar_lea.vmem [#allocation5], %s250_s10 }
  0x1d   : > { %s258_s24 = scalar_lea.vmem %s777_s0, %s447_s15  ;;  %312 = vmatpush.msra.mxu1 %v303_v4  ;;  %v292_v15 = vld [vmem:[#allocation2 + $0x10] sm:$0xff]  ;;  %v291_v16 = vld [vmem:[#allocation2 + $0x8] sm:$0xff]  ;;  %v290_v17 = vld [vmem:[#allocation2] sm:$0xff]  ;;  %s360_s15 = sshll.u32 %s251_s14, 4  ;;  %s361_s15 = int_to_ptr.vmem [resolvable:$true] %s360_s15 }
  0x1e   : > { %v259_v1 = vld [vmem:[%s258_s24] sm:$0xff]  ;;  %s565_s24 = sshra.s32 %s363_s16, 4  ;;  %s566_s24 = int_to_ptr.hbm [resolvable:$true] %s565_s24 }
  0x1f   : > { %448 = vmatmul.msk.f32.vlgmr.msra.gmra.mxu0 %vm265_vm0, %v259_v1  ;;  %313 = vmatpush.msra.mxu1 %v302_v5  ;;  %v519_v18 = vld [vmem:[%s779_s2] ss:$0 sm:$0xff]  ;;  %s567_s25 = scalar_lea.hbm %s566_s24, 1  ;;  %p572_p5 = scmp.lt.s32.totalorder %s566_s24, %s782_s5 }
  0x20   : > { %v520_v22 = vld [vmem:[%s781_s4] ss:$0 sm:$0xff]  ;;  %p568_p1 = scmp.ne.s32.totalorder %s566_s24, %s567_s25  ;;  %p573_p6 = scmp.lt.s32.totalorder %s571_s21, %s567_s25 }
  0x21   : > { %314 = vmatpush.msra.mxu1 %v301_v6 }
  0x22   : > { %p569_p2 = pnand %p568_p1, %p708_p4  ;;  %p574_p7 = por %p573_p6, %p572_p5 }
  0x23   : > { %315 = vmatpush.msra.mxu1 %v300_v7 }
  0x24   : > { %p570_p3 = pneg %p569_p2 }
  0x25   : > { %316 = vmatpush.msra.mxu1 %v299_v8 }
  0x26   : > { %p575_p9 = pnand %p574_p7, %p570_p3 }
  0x27   : > { %317 = vmatpush.msra.mxu1 %v298_v9 }
  0x29   : > { %318 = vmatpush.msra.mxu1 %v297_v10 }
  0x2b   : > { %319 = vmatpush.msra.mxu1 %v296_v11 }
  0x2d   : > { %320 = vmatpush.msra.mxu1 %v295_v12 }
  0x2f   : > { %321 = vmatpush.msra.mxu1 %v294_v13 }
  0x31   : > { %322 = vmatpush.msra.mxu1 %v293_v14 }
  0x33   : > { %323 = vmatpush.msra.mxu1 %v292_v15 }
  0x35   : > { %324 = vmatpush.msra.mxu1 %v291_v16 }
  0x37   : > { %325 = vmatpush.msra.mxu1 %v290_v17 }
  0x9c   : > { %v286_v19 = vpop.f32.mrf.mxu0 }
  0x9d   : > { %v287_v20 = vadd.f32 %v519_v18, %v286_v19 }
  0x9f   : > { %v289_v21 = vmax.f32 %v287_v20, 0.0 }
  0xa1   : > { %326 = vmatmul.f32.vlgmr.msra.gmra.mxu1 %v289_v21 }
 0x11e   : > { %v327_v23 = vpop.f32.mrf.mxu1 }
 0x11f   : > { %v328_v24 = vadd.f32 %v520_v22, %v327_v23 }
 0x121   : > { %v330_v25 = vmax.f32 %v328_v24, 0.0 }
 0x123   : > { %v331_v26 = vrot.slane %v330_v25, 4 }
 0x125   : > { %v332_v27 = vmax.f32 %v330_v25, %v331_v26 }
 0x127   : > { %v333_v28 = vrot.slane %v332_v27, 2 }
 0x129   : > { %v334_v29 = vmax.f32 %v332_v27, %v333_v28 }
 0x12b   : > { %v335_v30 = vrot.slane %v334_v29, 1 }
 0x12d   : > { %v336_v31 = vmax.f32 %v334_v29, %v335_v30 }
 0x12f   : > { %341 = vst [vmem:[%s251_s14] sm:$0x1] %v336_v31 }
 0x130   : > { %578 = shalt.err (!%p575_p9)
}
 0x131   : > { %455 = dma.vmem_to_hbm [thread:$0]  (%p708_p4), %s361_s15, 16, %s363_s16, %s350_s17  }
 0x132 PF: > { %p467_p10 = scmp.ge.s32.totalorder %s633_s23, 2  ;;  %s374_s9 = sand.u32 1, %s613_s18  }
 0x133   : > { %s375_s10 = scalar_lea.sflag [#allocation4], %s374_s9 }
 0x134   : > { %p462_p11 = pnand %p467_p10, %p715_p8 }
 0x136   : > { %p463_p12 = pneg %p462_p11 }
 0x138   : > { %608 = dma.done.wait (%p463_p12), %s375_s10, 16  }
 0x139   : > { %610 = vsyncadd (%p463_p12), %s375_s10, 4294967280  ;;  %s19_s23 = sadd.s32 1, %s633_s23   ;;  %s785_s18 = smov %s617_s19 }
 0x13a   : > { %p16_p13 = scmp.ge.s32.totalorder %s19_s23, 4   ;;  %s786_s19 = smov %s621_s20 }
 0x13b   : > { %s787_s20 = smov %s721_s6  ;;  %s788_s21 = smov %s629_s22 }
 0x13c   : > { %s789_s22 = smov %s791_s26  ;;  %18 = sbr.rel (!%p16_p13) target bundleno = 5 (0x5), region = 88 }
 0x141   :  { %380 = vsyncpa [#allocation3], 1 }
 0x142   :  { %382 = vsyncpa [#allocation3 + $0x1], 1 }
 0x143   :  { %383 = vsyncpa [#allocation4], 1 }
 0x144   :  { %385 = vsyncpa [#allocation4 + $0x1], 1 }

</bundles_post_ra>
